<compile_context>
chip_gen: v5e
topology: v5e:2x2
jax: 0.10.0
libtpu: 0.0.40
codegen_flags: <defaults>
</compile_context>

<pallas_src>
import jax
import jax.numpy as jnp
from jax import lax
from jax.experimental import pallas as pl
from jax.experimental.pallas import tpu as pltpu

_VMEM_LIMIT = 32 * 1024 * 1024  # safe on v5e/v6e/v7x for these tile sizes


# ----------------------------- Pallas kernels ------------------------------

def _conv_transpose_2x2_s2_kernel(x_ref, w_ref, b_ref, o_ref):
    """ConvTranspose2d(kernel=2, stride=2) as one wide matmul.

    x_ref: (1, H*W, Cin)      f32 (cast to bf16 for the MXU)
    w_ref: (Cin, 4*Cout)      bf16, merged sub-pixel weights, k = dy*2 + dx major
    b_ref: (1, 4*Cout)        f32 (bias tiled 4x)
    o_ref: (1, H*W, 4*Cout)   f32; the wrapper pixel-shuffles to (2H, 2W, Cout)
    """
    x = x_ref[0].astype(jnp.bfloat16)                       # (H*W, Cin)
    y = jnp.dot(x, w_ref[...], preferred_element_type=jnp.float32)
    o_ref[0] = y + b_ref[...]


def _make_conv3x3_flat_relu_kernel(width, num_inputs):
    """Conv2d(kernel=3, padding=0) + ReLU on a spatially-flattened image.

    Inputs (num_inputs of them, channel-concat is fused by splitting the weight):
      x_ref_k: (1, H*W + pad, C_k)   f32
      w_ref_k: (9, C_k, Cout)        bf16, tap-major (k = dy*3 + dx)
      b_ref  : (1, Cout)             f32
      o_ref  : (1, (H-2)*W, Cout)    f32; columns wo >= W-2 of each row are
                                     junk and are cropped by the wrapper.
    Each tap is a statically-shifted big-M slice, so every dot is
    ((H-2)*W, C_k) @ (C_k, Cout) on the MXU.
    """
    def kernel(*refs):
        x_refs = refs[:num_inputs]
        w_refs = refs[num_inputs:2 * num_inputs]
        b_ref = refs[2 * num_inputs]
        o_ref = refs[2 * num_inputs + 1]
        M = o_ref.shape[1]

        acc = None
        for dy in range(3):
            for dx in range(3):
                off = dy * width + dx                        # static offset
                k = dy * 3 + dx
                for x_ref, w_ref in zip(x_refs, w_refs):
                    patch = x_ref[0, off:off + M, :].astype(jnp.bfloat16)
                    d = jnp.dot(patch, w_ref[k],
                                preferred_element_type=jnp.float32)
                    acc = d if acc is None else acc + d
        o_ref[0] = jnp.maximum(acc + b_ref[...], 0.0)

    return kernel


# ----------------------------- Pallas wrappers ------------------------------

def conv_transpose_2x2_s2(x, w, b):
    """x: (N,H,W,Cin) NHWC f32; w: PyTorch layout (Cin, Cout, 2, 2); b: (Cout,)."""
    N, H, W, Cin = x.shape
    Cout = w.shape[1]
    L = H * W
    x_flat = x.reshape(N, L, Cin)
    # merged channel index = (dy*2 + dx)*Cout + c
    w_m = jnp.transpose(w, (0, 2, 3, 1)).reshape(Cin, 4 * Cout).astype(jnp.bfloat16)
    b_m = jnp.tile(b, 4).reshape(1, 4 * Cout).astype(jnp.float32)

    out = pl.pallas_call(
        _conv_transpose_2x2_s2_kernel,
        out_shape=jax.ShapeDtypeStruct((N, L, 4 * Cout), jnp.float32),
        grid=(N,),
        in_specs=[
            pl.BlockSpec((1, L, Cin), lambda n: (n, 0, 0)),
            pl.BlockSpec((Cin, 4 * Cout), lambda n: (0, 0)),
            pl.BlockSpec((1, 4 * Cout), lambda n: (0, 0)),
        ],
        out_specs=pl.BlockSpec((1, L, 4 * Cout), lambda n: (n, 0, 0)),
        compiler_params=pltpu.CompilerParams(
            dimension_semantics=("parallel",),
            vmem_limit_bytes=_VMEM_LIMIT),
    )(x_flat, w_m, b_m)

    # pixel-shuffle glue (layout only): (N,H,W,2,2,Cout) -> (N,2H,2W,Cout)
    out = out.reshape(N, H, W, 2, 2, Cout)
    out = jnp.transpose(out, (0, 1, 3, 2, 4, 5)).reshape(N, 2 * H, 2 * W, Cout)
    return out


def conv3x3_relu(xs, ws, b):
    """Valid 3x3 conv + ReLU, with the channel concat of `xs` fused in.

    xs: list of (N,H,W,C_k) NHWC f32 tensors (same spatial dims).
    ws: list of PyTorch-layout (Cout, C_k, 3, 3) weight slices (split along Cin).
    b : (Cout,)
    """
    N, H, W, _ = xs[0].shape
    Ho, Wo = H - 2, W - 2
    M = Ho * W                       # flattened output rows (incl. 2 junk cols/row)
    Cout = ws[0].shape[0]
    PAD = 8                          # tail pad so the dy=2,dx=2 tap stays in bounds
    L = H * W + PAD

    xs_flat = [jnp.pad(x.reshape(N, H * W, x.shape[-1]),
                       ((0, 0), (0, PAD), (0, 0))) for x in xs]
    # OIHW -> HWIO -> (9, C_k, Cout), tap-major (dy*3 + dx), bf16.
    ws_k = [jnp.transpose(w, (2, 3, 1, 0)).reshape(9, w.shape[1], Cout)
            .astype(jnp.bfloat16) for w in ws]
    b2 = b.reshape(1, Cout).astype(jnp.float32)

    in_specs = []
    for xf in xs_flat:
        in_specs.append(pl.BlockSpec((1, L, xf.shape[-1]), lambda n: (n, 0, 0)))
    for wk in ws_k:
        in_specs.append(pl.BlockSpec(wk.shape, lambda n: (0, 0, 0)))
    in_specs.append(pl.BlockSpec((1, Cout), lambda n: (0, 0)))

    out = pl.pallas_call(
        _make_conv3x3_flat_relu_kernel(W, len(xs)),
        out_shape=jax.ShapeDtypeStruct((N, M, Cout), jnp.float32),
        grid=(N,),
        in_specs=in_specs,
        out_specs=pl.BlockSpec((1, M, Cout), lambda n: (n, 0, 0)),
        compiler_params=pltpu.CompilerParams(
            dimension_semantics=("parallel",),
            vmem_limit_bytes=_VMEM_LIMIT),
    )(*xs_flat, *ws_k, b2)

    # Crop the 2 junk columns produced by the flattening trick.
    return out.reshape(N, Ho, W, Cout)[:, :, :Wo, :]


# ----------------------------- Decoder module -------------------------------

def init_decoder_params(key, chs):
    """Deterministic synthetic parameters with PyTorch-layout shapes."""
    p = {"up_w": [], "up_b": [], "c1_w": [], "c1_b": [], "c2_w": [], "c2_b": []}
    for i in range(len(chs) - 1):
        cin, cout = chs[i], chs[i + 1]
        ks = jax.random.split(jax.random.fold_in(key, i), 6)
        p["up_w"].append(0.1 * jax.random.normal(ks[0], (cin, cout, 2, 2), jnp.float32))
        p["up_b"].append(0.1 * jax.random.normal(ks[1], (cout,), jnp.float32))
        p["c1_w"].append(0.1 * jax.random.normal(ks[2], (cout, cin, 3, 3), jnp.float32))
        p["c1_b"].append(0.1 * jax.random.normal(ks[3], (cout,), jnp.float32))
        p["c2_w"].append(0.1 * jax.random.normal(ks[4], (cout, cout, 3, 3), jnp.float32))
        p["c2_b"].append(0.1 * jax.random.normal(ks[5], (cout,), jnp.float32))
    return p


def _center_crop(enc_nhwc, H, W):
    # torchvision CenterCrop semantics (crop smaller than input).
    # TODO(synk): CenterCrop pads when the requested size exceeds the input;
    #             not needed in the standard U-Net decoder path.
    eh, ew = enc_nhwc.shape[1], enc_nhwc.shape[2]
    top = int(round((eh - H) / 2.0))
    left = int(round((ew - W) / 2.0))
    return enc_nhwc[:, top:top + H, left:left + W, :]


def decoder_forward(params, x_nchw, encoder_features_nchw, chs):
    x = jnp.transpose(x_nchw, (0, 2, 3, 1)).astype(jnp.float32)   # NCHW -> NHWC
    for i in range(len(chs) - 1):
        x = conv_transpose_2x2_s2(x, params["up_w"][i], params["up_b"][i])
        enc = jnp.transpose(encoder_features_nchw[i], (0, 2, 3, 1)).astype(jnp.float32)
        enc = _center_crop(enc, x.shape[1], x.shape[2])
        # Fused cat([x, enc], channel) + conv1 + ReLU: split conv1 weight on Cin.
        cx = x.shape[-1]
        c1_w = params["c1_w"][i]
        x = conv3x3_relu([x, enc], [c1_w[:, :cx], c1_w[:, cx:]], params["c1_b"][i])
        x = conv3x3_relu([x], [params["c2_w"][i]], params["c2_b"][i])
    return jnp.transpose(x, (0, 3, 1, 2))                         # NHWC -> NCHW


# ----------------------------- Pure-JAX reference ---------------------------

def _conv3x3_relu_ref(x, w, b):
    w_hwio = jnp.transpose(w, (2, 3, 1, 0))
    y = lax.conv_general_dilated(x, w_hwio, (1, 1), "VALID",
                                 dimension_numbers=("NHWC", "HWIO", "NHWC"))
    return jnp.maximum(y + b, 0.0)


def _conv_transpose_ref(x, w, b):
    N, H, W, _ = x.shape
    Cout = w.shape[1]
    y = jnp.einsum("nhwi,iopq->nhpwqo", x, w).reshape(N, 2 * H, 2 * W, Cout)
    return y + b


def decoder_forward_ref(params, x_nchw, encoder_features_nchw, chs):
    x = jnp.transpose(x_nchw, (0, 2, 3, 1)).astype(jnp.float32)
    for i in range(len(chs) - 1):
        x = _conv_transpose_ref(x, params["up_w"][i], params["up_b"][i])
        enc = jnp.transpose(encoder_features_nchw[i], (0, 2, 3, 1)).astype(jnp.float32)
        enc = _center_crop(enc, x.shape[1], x.shape[2])
        x = jnp.concatenate([x, enc], axis=-1)
        x = _conv3x3_relu_ref(x, params["c1_w"][i], params["c1_b"][i])
        x = _conv3x3_relu_ref(x, params["c2_w"][i], params["c2_b"][i])
    return jnp.transpose(x, (0, 3, 1, 2))


# ----------------------------------- main ------------------------------------

if __name__ == "__main__":
    chs = (32, 16, 8)            # small version of (1024, 512, 256, 128, 64)
    N = 2
    key = jax.random.PRNGKey(0)
    k_x, k_e0, k_e1, k_p = jax.random.split(key, 4)

    # x: NCHW like the PyTorch module
    x = jax.random.normal(k_x, (N, chs[0], 8, 8), jnp.float32)
    encoder_features = [
        jax.random.normal(k_e0, (N, chs[1], 20, 20), jnp.float32),
        jax.random.normal(k_e1, (N, chs[2], 26, 26), jnp.float32),
    ]
    params = init_decoder_params(k_p, chs)

    out = decoder_forward(params, x, encoder_features, chs)
    out = jax.block_until_ready(out)

    # Shape/semantics sanity check against a pure-f32 JAX reference.  The
    # kernels use bf16 matmul operands with f32 accumulation, so the tolerance
    # is loosened accordingly.
    ref = decoder_forward_ref(params, x, encoder_features, chs)
    assert out.shape == (N, chs[-1], 20, 20), out.shape
    assert bool(jnp.all(jnp.isfinite(out)))
    assert bool(jnp.allclose(out, ref, rtol=5e-2, atol=5e-2)), \
        float(jnp.max(jnp.abs(out - ref)))

    print("KERNEL_OK")
</pallas_src>

<mosaic_0001>
module attributes {stable_mosaic.version = 11 : i64} {
  func.func @_conv_transpose_2x2_s2_kernel(%arg0: i32, %arg1: memref<1x64x32xf32, #tpu.memory_space<vmem>>, %arg2: memref<32x64xbf16, #tpu.memory_space<vmem>>, %arg3: memref<1x64xf32, #tpu.memory_space<vmem>>, %arg4: memref<1x64x64xf32, #tpu.memory_space<vmem>>) attributes {dimension_semantics = [#tpu.dimension_semantics<parallel>], iteration_bounds = array<i64: 2>, scalar_prefetch = 0 : i64, scratch_operands = 0 : i64, tpu.core_type = #tpu.core_type<tc>, window_params = [{transform_indices = @transform_0, window_bounds = array<i64: 1, 64, 32>}, {pipeline_mode = #tpu.pipeline_mode<synchronous>, transform_indices = @transform_1, window_bounds = array<i64: 32, 64>}, {pipeline_mode = #tpu.pipeline_mode<synchronous>, transform_indices = @transform_2, window_bounds = array<i64: 1, 64>}, {transform_indices = @transform_3, window_bounds = array<i64: 1, 64, 64>}]} {
    %c0 = arith.constant 0 : index
    %c0_0 = arith.constant 0 : index
    %c0_1 = arith.constant 0 : index
    %0 = vector.load %arg1[%c0, %c0_0, %c0_1] : memref<1x64x32xf32, #tpu.memory_space<vmem>>, vector<1x64x32xf32>
    %1 = vector.shape_cast %0 : vector<1x64x32xf32> to vector<64x32xf32>
    %2 = arith.truncf %1 : vector<64x32xf32> to vector<64x32xbf16>
    %c0_2 = arith.constant 0 : index
    %c0_3 = arith.constant 0 : index
    %3 = vector.load %arg2[%c0_2, %c0_3] : memref<32x64xbf16, #tpu.memory_space<vmem>>, vector<32x64xbf16>
    %cst = arith.constant dense<0.000000e+00> : vector<64x64xf32>
    %4 = tpu.matmul %2, %3, %cst {dimension_numbers = #tpu.dot_dimension_numbers<[1], [0], [0], [1], [0, 0, 1, 1], [], []>} : vector<64x32xbf16>, vector<32x64xbf16>, vector<64x64xf32> -> vector<64x64xf32>
    %c0_4 = arith.constant 0 : index
    %c0_5 = arith.constant 0 : index
    %5 = vector.load %arg3[%c0_4, %c0_5] : memref<1x64xf32, #tpu.memory_space<vmem>>, vector<1x64xf32>
    %6 = vector.broadcast %5 : vector<1x64xf32> to vector<64x64xf32>
    %7 = arith.addf %4, %6 : vector<64x64xf32>
    %c0_6 = arith.constant 0 : index
    %c0_7 = arith.constant 0 : index
    %c0_8 = arith.constant 0 : index
    %8 = vector.load %arg4[%c0_6, %c0_7, %c0_8] : memref<1x64x64xf32, #tpu.memory_space<vmem>>, vector<1x64x64xf32>
    %9 = vector.shape_cast %8 : vector<1x64x64xf32> to vector<64x64xf32>
    %10 = vector.shape_cast %7 : vector<64x64xf32> to vector<1x64x64xf32>
    tpu.vector_store %arg4[%c0_6, %c0_7, %c0_8], %10 {strides = array<i32>} : memref<1x64x64xf32, #tpu.memory_space<vmem>>, vector<1x64x64xf32>,
    return
  }
  func.func @transform_0(%arg0: i32) -> (i32, i32, i32) {
    %c0_i32 = arith.constant 0 : i32
    %c0_i32_0 = arith.constant 0 : i32
    %c0_i32_1 = arith.constant 0 : i32
    return %arg0, %c0_i32, %c0_i32_0 : i32, i32, i32
  }
  func.func @transform_1(%arg0: i32) -> (i32, i32) {
    %c0_i32 = arith.constant 0 : i32
    %c0_i32_0 = arith.constant 0 : i32
    %c0_i32_1 = arith.constant 0 : i32
    return %c0_i32, %c0_i32_0 : i32, i32
  }
  func.func @transform_2(%arg0: i32) -> (i32, i32) {
    %c0_i32 = arith.constant 0 : i32
    %c0_i32_0 = arith.constant 0 : i32
    %c0_i32_1 = arith.constant 0 : i32
    return %c0_i32, %c0_i32_0 : i32, i32
  }
  func.func @transform_3(%arg0: i32) -> (i32, i32, i32) {
    %c0_i32 = arith.constant 0 : i32
    %c0_i32_0 = arith.constant 0 : i32
    %c0_i32_1 = arith.constant 0 : i32
    return %arg0, %c0_i32, %c0_i32_0 : i32, i32, i32
  }
}

</mosaic_0001>

<bundles_post_ra>
// kernel: tpu_custom_call.1
= control target key start
LH: loop header
LB: loop body
LE: loop exit
PB: predicated region body
PF: predicated region fallthrough
CT: control target
= control target key end

     0   :  { %8 = vsyncpa [#allocation3], 0  ;;  %s603_s0 = inlined_call_operand.vmem [shape: f32[2,64,32], index: 0, kind: input, shape index: {}]   ;;  %s604_s1 = inlined_call_operand.vmem [shape: bf16[32,64], index: 1, kind: input, shape index: {}]   ;;  %s605_s2 = inlined_call_operand.vmem [shape: f32[1,64], index: 2, kind: input, shape index: {}]   ;;  %s606_s3 = inlined_call_operand.hbm [shape: f32[2,64,64], index: 3, kind: output, shape index: {}]  }
   0x1   :  { %10 = vsyncpa [#allocation3 + $0x1], 0  ;;  %s493_s12 = smov 0   ;;  %s495_s13 = smov 0  }
   0x2   :  { %s497_s14 = smov 0   ;;  %s499_s15 = smov 0  }
   0x3 LB: > { %s514_s16 = sadd.s32 4294967295, %s469_s15   ;;  %s331_s17 = sadd.s32 4294967294, %s469_s15   ;;  %s469_s15 = sphi %s499_s15, %s612_s15   ;;  %s465_s14 = sphi %s497_s14, %s611_s14   ;;  %s461_s13 = sphi %s495_s13, %s610_s13   ;;  %s457_s12 = sphi %s493_s12, %s609_s12  }
   0x4   : > { %s518_s18 = sadd.s32 1, %s469_s15   ;;  %s91_s19 = sadd.s32 1, %s465_s14 }
   0x5   : > { %s88_s20 = ssub.s32 %s469_s15, %s518_s18  ;;  %p101_p0 = scmp.ne.s32.totalorder %s465_s14, %s461_s13 }
   0x6   : > { %p89_p1 = scmp.eq.s32.totalorder %s88_s20, 0  ;;  %p102_p2 = scmp.eq.s32.totalorder %s514_s16, 1 }
   0x7   : > { %p107_p3 = scmp.ne.s32.totalorder %s461_s13, %s457_s12  ;;  %p108_p4 = scmp.eq.s32.totalorder %s331_s17, 1 }
   0x8   : > { %s529_s21 = scalar_select %p89_p1, %s465_s14, %s91_s19  }
   0x9   : > { %p531_p5 = por %p102_p2, %p101_p0  ;;  %p535_p6 = por %p108_p4, %p107_p3 }
   0xa   : > { %p334_p7 = scmp.ge.s32.totalorder %s469_s15, 1  ;;  %p140_p8 = scmp.lt.s32.totalorder %s469_s15, 3 }
   0xc   : > { %p141_p9 = pnand %p334_p7, %p140_p8 }
   0xd   : > { %p164_p10 = scmp.lt.s32.totalorder (!%p141_p9), %s514_s16, 1  ;;  %s161_s6 = sand.u32 (!%p141_p9), 1, %s461_s13  }
   0xe   : > { %144 = sbr.rel (%p141_p9) target bundleno = 175 (0xaf), region = 32  ;;  %s335_s7 = sshll.u32 (!%p141_p9), %s161_s6, 6 }
   0xf   : > { %s163_s10 = scalar_lea.vmem (!%p141_p9), [#allocation2], %s335_s7  ;;  %s358_s11 = sshll.u32 (!%p141_p9), %s514_s16, 6 }
  0x10   : > { %s265_s20 = scalar_lea.hbm (!%p141_p9), %s606_s3, %s358_s11  ;;  %s254_s25 = scalar_lea.sflag (!%p141_p9), [#allocation3], %s161_s6 }
  0x11   : > { %s268_s24 = sshll.u32 (!%p141_p9), %s265_s20, 4  ;;  %s427_s30 = scalar_lea.hbm (!%p141_p9), %s606_s3, 128  ;;  %s269_s24 = int_to_ptr.hbm [resolvable:$true] %s268_s24 }
  0x12   : > { %s421_s26 = sshra.s32 (!%p141_p9), %s269_s24, 4  ;;  %s422_s26 = int_to_ptr.hbm [resolvable:$true] %s421_s26 }
  0x13   : > { %v357_v0 = vld [vmem:[%s604_s1 + $0x8] sm:$0xff]  ;;  %v356_v1 = vld [vmem:[%s604_s1] sm:$0xff]  ;;  %s165_s28 = scalar_select %p164_p10, %s514_s16, 1  ;;  %vm202_vm0 = vcmask 261120   ;;  %vm244_vm1 = vcmask 523264  }
  0x14   : > { %221 = vmatpush.bf16.msra.mxu0 %v357_v0  ;;  %359 = vmatpush.bf16.msra.mxu1 %v357_v0  ;;  %v406_v14 = vld [vmem:[%s605_s2] ss:$0 sm:$0xff]  ;;  %s266_s16 = sshll.u32 %s163_s10, 4  ;;  %s423_s27 = scalar_lea.hbm %s422_s26, 64  ;;  %s267_s16 = int_to_ptr.vmem [resolvable:$true] %s266_s16 }
  0x15   : > { %360 = vmatpush.bf16.msra.mxu2 %v357_v0  ;;  %361 = vmatpush.bf16.msra.mxu3 %v357_v0  ;;  %s355_s29 = sshll.u32 %s165_s28, 6  ;;  %p424_p11 = scmp.ne.s32.totalorder %s422_s26, %s423_s27 }
  0x16   : > { %s168_s5 = scalar_lea.vmem %s603_s0, %s355_s29  ;;  %p428_p0 = scmp.lt.s32.totalorder %s422_s26, %s606_s3 }
  0x17   : > { %v170_v2 = vld [vmem:[%s168_s5] sm:$0xff]  ;;  %v171_v3 = vld [vmem:[%s168_s5 + $0x8] sm:$0xff]  ;;  %v172_v4 = vld [vmem:[%s168_s5 + $0x10] sm:$0xff]  ;;  %p425_p12 = pnand %p424_p11, %p531_p5  ;;  %p429_p1 = scmp.lt.s32.totalorder %s427_s30, %s423_s27 }
  0x18   : > { %222 = vmatpush.bf16.msra.mxu0 %v356_v1  ;;  %362 = vmatpush.bf16.msra.mxu1 %v356_v1  ;;  %v178_v5 = vpack.c.bf16 %v171_v3, %v170_v2  ;;  %v173_v6 = vld [vmem:[%s168_s5 + $0x18] sm:$0xff]  ;;  %v174_v7 = vld [vmem:[%s168_s5 + $0x20] sm:$0xff]  ;;  %v175_v8 = vld [vmem:[%s168_s5 + $0x28] sm:$0xff] }
  0x19   : > { %363 = vmatpush.bf16.msra.mxu2 %v356_v1  ;;  %364 = vmatpush.bf16.msra.mxu3 %v356_v1  ;;  %v179_v9 = vpack.c.bf16 %v173_v6, %v172_v4  ;;  %v180_v10 = vpack.c.bf16 %v175_v8, %v174_v7  ;;  %v176_v11 = vld [vmem:[%s168_s5 + $0x30] sm:$0xff]  ;;  %v177_v12 = vld [vmem:[%s168_s5 + $0x38] sm:$0xff]  ;;  %p426_p13 = pneg %p425_p12  ;;  %p430_p2 = por %p429_p1, %p428_p0 }
  0x1a   : > { %v181_v13 = vpack.c.bf16 %v177_v12, %v176_v11 }
  0x1b   : > { %346 = vmatmul.msk.bf16.vlgmr.msra.gmra.mxu0 %vm202_vm0, %v178_v5  ;;  %347 = vmatmul.msk.bf16.vlgmr.msra.gmra.mxu1 %vm202_vm0, %v179_v9  ;;  %p431_p3 = pnand %p430_p2, %p426_p13 }
  0x1c   : > { %348 = vmatmul.msk.bf16.vlgmr.msra.gmra.mxu2 %vm202_vm0, %v180_v10  ;;  %349 = vmatmul.msk.bf16.vlgmr.msra.gmra.mxu3 %vm202_vm0, %v181_v13 }
  0x98   : > { %v224_v15 = vpop.f32.mrf.mxu0  ;;  %v229_v17 = vpop.f32.mrf.mxu1 }
  0x99   : > { %v225_v16 = vadd.f32 %v406_v14, %v224_v15  ;;  %v230_v18 = vadd.f32 %v406_v14, %v229_v17 }
  0x9b   : > { %245 = vst.msk [vmem:[%s163_s10] sm:$0xff] %vm244_vm1, %v225_v16 }
  0x9c   : > { %247 = vst.msk [vmem:[%s163_s10 + $0x10] sm:$0xff] %vm244_vm1, %v230_v18 }
  0x9f   : > { %v234_v19 = vpop.f32.mrf.mxu2  ;;  %v239_v21 = vpop.f32.mrf.mxu3 }
  0xa0   : > { %v235_v20 = vadd.f32 %v406_v14, %v234_v19  ;;  %v226_v22 = vpop.f32.mrf.mxu0  ;;  %v240_v23 = vadd.f32 %v406_v14, %v239_v21  ;;  %v231_v25 = vpop.f32.mrf.mxu1 }
  0xa1   : > { %v227_v24 = vadd.f32 %v406_v14, %v226_v22  ;;  %v232_v26 = vadd.f32 %v406_v14, %v231_v25 }
  0xa2   : > { %249 = vst.msk [vmem:[%s163_s10 + $0x20] sm:$0xff] %vm244_vm1, %v235_v20 }
  0xa3   : > { %251 = vst.msk [vmem:[%s163_s10 + $0x30] sm:$0xff] %vm244_vm1, %v240_v23 }
  0xa4   : > { %246 = vst.msk [vmem:[%s163_s10 + $0x8] sm:$0xff] %vm244_vm1, %v227_v24 }
  0xa5   : > { %248 = vst.msk [vmem:[%s163_s10 + $0x18] sm:$0xff] %vm244_vm1, %v232_v26 }
  0xa7   : > { %v236_v27 = vpop.f32.mrf.mxu2  ;;  %v241_v29 = vpop.f32.mrf.mxu3 }
  0xa8   : > { %v237_v28 = vadd.f32 %v406_v14, %v236_v27  ;;  %v242_v30 = vadd.f32 %v406_v14, %v241_v29 }
  0xaa   : > { %250 = vst.msk [vmem:[%s163_s10 + $0x28] sm:$0xff] %vm244_vm1, %v237_v28 }
  0xab   : > { %252 = vst.msk [vmem:[%s163_s10 + $0x38] sm:$0xff] %vm244_vm1, %v242_v30 }
  0xac   : > { %434 = shalt.err (!%p431_p3)
}
  0xad   : > { %s471_s6 = smov 128   ;;  %s472_s7 = smov 8  }
  0xae   : > { %365 = dma.vmem_to_hbm [thread:$0]  (%p531_p5), %s267_s16, 1024, %s269_s24, %s254_s25, %s471_s6, %s471_s6, %s472_s7  }
  0xaf PF: > { %p371_p4 = scmp.ge.s32.totalorder %s469_s15, 2  ;;  %s283_s8 = sand.u32 1, %s457_s12  }
  0xb0   : > { %s284_s9 = scalar_lea.sflag [#allocation3], %s283_s8 }
  0xb1   : > { %p368_p7 = pnand %p371_p4, %p535_p6 }
  0xb3   : > { %p369_p8 = pneg %p368_p7 }
  0xb5   : > { %452 = dma.done.wait (%p369_p8), %s284_s9, 1024  }
  0xb6   : > { %454 = vsyncadd (%p369_p8), %s284_s9, 4294966272  ;;  %p13_p9 = scmp.ge.s32.totalorder %s518_s18, 4   ;;  %s609_s12 = smov %s461_s13 }
  0xb7   : > { %s610_s13 = smov %s465_s14  ;;  %s611_s14 = smov %s529_s21 }
  0xb8   : > { %s612_s15 = smov %s518_s18  ;;  %15 = sbr.rel (!%p13_p9) target bundleno = 3 (0x3), region = 67 }
  0xbd   :  { %290 = vsyncpa [#allocation3], 1 }
  0xbe   :  { %292 = vsyncpa [#allocation3 + $0x1], 1 }

</bundles_post_ra>
